<compile_context>
chip_gen: v7x
topology: tpu7x:2x2x1
jax: 0.10.0
libtpu: 0.0.40
codegen_flags: <defaults>
</compile_context>

<pallas_src>
import jax
import jax.numpy as jnp
from jax.experimental import pallas as pl
from jax.experimental.pallas import tpu as pltpu

IMAGE_SIZE = 16 * 16           # C*H*W (matches x.view(-1, image_size)); lane-aligned (256 % 128 == 0)
H0, H1, NUM_CLASSES = 100, 50, 10
H0P, H1P, CP = 128, 128, 128   # physical (lane-padded) widths


def _round_up(n, m):
    return ((n + m - 1) // m) * m


def _mlp_kernel(x_ref, w0_ref, b0_ref, w1_ref, b1_ref, w2_ref, b2_ref, out_ref):
    """One batch tile of the fused 3-layer MLP + log_softmax."""
    # In-kernel cast of x to the matmul operand dtype (no-op when weights are f32).
    x = x_ref[...].astype(w0_ref.dtype)                               # (TB, 256)

    # fc0 + relu (f32 MXU accumulation regardless of operand dtype)
    h0 = jnp.dot(x, w0_ref[...], preferred_element_type=jnp.float32) + b0_ref[...]
    h0 = jnp.maximum(h0, 0.0)                                         # (TB, 128), pad lanes exactly 0

    # fc1 + relu
    h1 = jnp.dot(h0.astype(w1_ref.dtype), w1_ref[...],
                 preferred_element_type=jnp.float32) + b1_ref[...]
    h1 = jnp.maximum(h1, 0.0)                                         # (TB, 128)

    # fc2 (logits, padded to 128 classes)
    logits = jnp.dot(h1.astype(w2_ref.dtype), w2_ref[...],
                     preferred_element_type=jnp.float32) + b2_ref[...]  # (TB, 128)

    # Mask padded class lanes to -inf so log_softmax over 128 lanes == log_softmax over 10.
    col = jax.lax.broadcasted_iota(jnp.int32, logits.shape, 1)
    logits = jnp.where(col < NUM_CLASSES, logits, -jnp.inf)

    # Numerically stable log_softmax.
    m = jnp.max(logits, axis=-1, keepdims=True)
    shifted = logits - m
    lse = jnp.log(jnp.sum(jnp.exp(shifted), axis=-1, keepdims=True))
    out_ref[...] = (shifted - lse).astype(out_ref.dtype)              # lane-dense (TB, 128) store


def prepare_params(params, compute_dtype=jnp.bfloat16):
    """One-time layout prep: transpose Linear weights to (in, out) and zero-pad to 128 lanes.

    `compute_dtype` applies to the matmul operands (weights + in-kernel x cast); bf16 is the
    default (best HBM/MXU throughput on v5e/v6e/v7x, f32 accumulation keeps error ~1e-3).
    Pass jnp.float32 to match PyTorch numerics exactly. Biases stay float32 (added to the
    f32 accumulator).
    """
    w0, b0, w1, b1, w2, b2 = params

    def pad(a, rows, cols, dtype):
        buf = jnp.zeros((rows, cols), dtype)
        return buf.at[: a.shape[0], : a.shape[1]].set(a.astype(dtype))

    w0p = pad(w0.T, IMAGE_SIZE, H0P, compute_dtype)
    b0p = pad(b0.reshape(1, -1), 1, H0P, jnp.float32)
    w1p = pad(w1.T, H0P, H1P, compute_dtype)
    b1p = pad(b1.reshape(1, -1), 1, H1P, jnp.float32)
    w2p = pad(w2.T, H1P, CP, compute_dtype)
    b2p = pad(b2.reshape(1, -1), 1, CP, jnp.float32)
    return (w0p, b0p, w1p, b1p, w2p, b2p)


def first_network_forward(x, prepared_params, *, block_b=1024,
                          out_dtype=jnp.float32, trim=True):
    """Fused forward pass.

    x: any shape whose trailing dims flatten to IMAGE_SIZE per row (e.g. NCHW). Not cast in
    the wrapper -- the per-tile cast happens inside the kernel.
    trim=True  -> (B, 10) log-probs (module semantics).
    trim=False -> (B, 128) lane-padded log-probs (padded class lanes are -inf); avoids the
                  column-slice pass for consumers (loss/argmax) that read the 10 valid lanes.
    out_dtype: jnp.bfloat16 halves output writeback bytes if downstream tolerates it.
    """
    w0p, b0p, w1p, b1p, w2p, b2p = prepared_params

    x2 = x.reshape(-1, IMAGE_SIZE)          # == x.view(-1, image_size); no dtype cast here
    B = x2.shape[0]

    # Batch tile: multiple of 8 sublanes, capped at block_b (sweep 512/1024/2048 on real
    # batches). When the batch is big enough, cap TB at ceil(B/2) so the grid has >= 2 steps
    # and both v7x TensorCores get work (dimension_semantics=("parallel",)).
    TB = min(block_b, _round_up(B, 8))
    if B >= 16:
        TB = min(TB, _round_up(pl.cdiv(B, 2), 8))
    num_tiles = pl.cdiv(B, TB)
    # Ragged batches: no padded copy of x. Pallas handles the partial last block (out-of-bounds
    # input rows hold unspecified values; the computation is purely row-wise, and out-of-bounds
    # output rows are discarded on writeback).

    resident = lambda i: (0, 0)   # same block index every grid step -> weights stay in VMEM

    out = pl.pallas_call(
        _mlp_kernel,
        out_shape=jax.ShapeDtypeStruct((B, CP), out_dtype),
        grid=(num_tiles,),
        in_specs=[
            pl.BlockSpec((TB, IMAGE_SIZE), lambda i: (i, 0)),         # streamed x tiles (pipelined)
            pl.BlockSpec((IMAGE_SIZE, H0P), resident),
            pl.BlockSpec((1, H0P), resident),
            pl.BlockSpec((H0P, H1P), resident),
            pl.BlockSpec((1, H1P), resident),
            pl.BlockSpec((H1P, CP), resident),
            pl.BlockSpec((1, CP), resident),
        ],
        out_specs=pl.BlockSpec((TB, CP), lambda i: (i, 0)),           # lane-dense 128-wide output
        compiler_params=pltpu.CompilerParams(
            dimension_semantics=("parallel",),                        # v7x: 2 TCs share the batch grid
        ),
    )(x2, w0p, b0p, w1p, b1p, w2p, b2p)

    return out[:, :NUM_CLASSES] if trim else out


def init_params(key):
    """Deterministic init matching torch.nn.Linear shapes: W (out,in), b (out,)."""
    ks = jax.random.split(key, 6)

    def uniform(k, shape, fan_in):
        bound = 1.0 / jnp.sqrt(fan_in)
        return jax.random.uniform(k, shape, jnp.float32, -bound, bound)

    w0 = uniform(ks[0], (H0, IMAGE_SIZE), IMAGE_SIZE)
    b0 = uniform(ks[1], (H0,), IMAGE_SIZE)
    w1 = uniform(ks[2], (H1, H0), H0)
    b1 = uniform(ks[3], (H1,), H0)
    w2 = uniform(ks[4], (NUM_CLASSES, H1), H1)
    b2 = uniform(ks[5], (NUM_CLASSES,), H1)
    return (w0, b0, w1, b1, w2, b2)


def _reference(x, params):
    """Pure-JAX reference for correctness check."""
    w0, b0, w1, b1, w2, b2 = params
    h = x.reshape(-1, IMAGE_SIZE)
    h = jnp.maximum(h @ w0.T + b0, 0.0)
    h = jnp.maximum(h @ w1.T + b1, 0.0)
    logits = h @ w2.T + b2
    return jax.nn.log_softmax(logits, axis=1)


if __name__ == "__main__":
    key = jax.random.PRNGKey(0)
    k_x, k_x2, k_p = jax.random.split(key, 3)

    params = init_params(k_p)
    prepared_f32 = prepare_params(params, compute_dtype=jnp.float32)  # exact-match operands
    prepared_bf16 = prepare_params(params)                            # default: bf16 operands

    # Small NCHW input: batch=8, channels=1, 16x16 spatial -> image_size = 256
    x = jax.random.normal(k_x, (8, 1, 16, 16), dtype=jnp.float32)
    out = jax.block_until_ready(first_network_forward(x, prepared_f32))
    ref = _reference(x, params)
    assert out.shape == (8, NUM_CLASSES)
    assert jnp.allclose(out, ref, atol=1e-5, rtol=1e-5), "mismatch vs reference (B=8, f32)"

    # Ragged batch (600 = 2*256 + 88): exercises the multi-tile grid and the un-padded
    # partial last block (no jnp.pad copy of x, no row slice of the output).
    xb = jax.random.normal(k_x2, (600, 1, 16, 16), dtype=jnp.float32)
    outb = jax.block_until_ready(first_network_forward(xb, prepared_f32, block_b=256))
    refb = _reference(xb, params)
    assert outb.shape == (600, NUM_CLASSES)
    assert jnp.allclose(outb, refb, atol=1e-5, rtol=1e-5), "mismatch vs reference (B=600, f32)"

    # Default bf16 operands (f32 accumulation): looser tolerance vs the f32 reference.
    outb16 = jax.block_until_ready(first_network_forward(xb, prepared_bf16))
    assert outb16.shape == (600, NUM_CLASSES)
    assert jnp.max(jnp.abs(outb16 - refb)) < 5e-2, "mismatch vs reference (B=600, bf16)"

    # Untrimmed, bf16-output path: (B, 128) lane-padded log-probs, consumer reads 10 lanes.
    out_full = jax.block_until_ready(
        first_network_forward(xb, prepared_bf16, trim=False, out_dtype=jnp.bfloat16))
    assert out_full.shape == (600, CP)
    assert jnp.max(jnp.abs(out_full[:, :NUM_CLASSES].astype(jnp.float32) - refb)) < 7.5e-2, \
        "mismatch vs reference (B=600, bf16 out, untrimmed)"

    print("KERNEL_OK")
</pallas_src>

<mosaic_0001>
module attributes {stable_mosaic.version = 11 : i64} {
  func.func @_mlp_kernel(%arg0: i32, %arg1: memref<8x256xf32, #tpu.memory_space<vmem>>, %arg2: memref<256x128xf32, #tpu.memory_space<vmem>>, %arg3: memref<1x128xf32, #tpu.memory_space<vmem>>, %arg4: memref<128x128xf32, #tpu.memory_space<vmem>>, %arg5: memref<1x128xf32, #tpu.memory_space<vmem>>, %arg6: memref<128x128xf32, #tpu.memory_space<vmem>>, %arg7: memref<1x128xf32, #tpu.memory_space<vmem>>, %arg8: memref<8x128xf32, #tpu.memory_space<vmem>>) attributes {dimension_semantics = [#tpu.dimension_semantics<parallel>], iteration_bounds = array<i64: 1>, scalar_prefetch = 0 : i64, scratch_operands = 0 : i64, tpu.core_type = #tpu.core_type<tc>, window_params = [{transform_indices = @transform_0, window_bounds = array<i64: 8, 256>}, {pipeline_mode = #tpu.pipeline_mode<synchronous>, transform_indices = @transform_1, window_bounds = array<i64: 256, 128>}, {pipeline_mode = #tpu.pipeline_mode<synchronous>, transform_indices = @transform_2, window_bounds = array<i64: 1, 128>}, {pipeline_mode = #tpu.pipeline_mode<synchronous>, transform_indices = @transform_3, window_bounds = array<i64: 128, 128>}, {pipeline_mode = #tpu.pipeline_mode<synchronous>, transform_indices = @transform_4, window_bounds = array<i64: 1, 128>}, {pipeline_mode = #tpu.pipeline_mode<synchronous>, transform_indices = @transform_5, window_bounds = array<i64: 128, 128>}, {pipeline_mode = #tpu.pipeline_mode<synchronous>, transform_indices = @transform_6, window_bounds = array<i64: 1, 128>}, {transform_indices = @transform_7, window_bounds = array<i64: 8, 128>}]} {
    %c0 = arith.constant 0 : index
    %c0_0 = arith.constant 0 : index
    %0 = vector.load %arg1[%c0, %c0_0] : memref<8x256xf32, #tpu.memory_space<vmem>>, vector<8x256xf32>
    %c0_1 = arith.constant 0 : index
    %c0_2 = arith.constant 0 : index
    %1 = vector.load %arg2[%c0_1, %c0_2] : memref<256x128xf32, #tpu.memory_space<vmem>>, vector<256x128xf32>
    %cst = arith.constant dense<0.000000e+00> : vector<8x128xf32>
    %2 = tpu.matmul %0, %1, %cst {dimension_numbers = #tpu.dot_dimension_numbers<[1], [0], [0], [1], [0, 0, 1, 1], [], []>} : vector<8x256xf32>, vector<256x128xf32>, vector<8x128xf32> -> vector<8x128xf32>
    %c0_3 = arith.constant 0 : index
    %c0_4 = arith.constant 0 : index
    %3 = vector.load %arg3[%c0_3, %c0_4] : memref<1x128xf32, #tpu.memory_space<vmem>>, vector<1x128xf32>
    %4 = vector.broadcast %3 : vector<1x128xf32> to vector<8x128xf32>
    %5 = arith.addf %2, %4 : vector<8x128xf32>
    %cst_5 = arith.constant 0.000000e+00 : f32
    %6 = vector.broadcast %cst_5 : f32 to vector<8x128xf32>
    %7 = arith.maximumf %5, %6 : vector<8x128xf32>
    %c0_6 = arith.constant 0 : index
    %c0_7 = arith.constant 0 : index
    %8 = vector.load %arg4[%c0_6, %c0_7] : memref<128x128xf32, #tpu.memory_space<vmem>>, vector<128x128xf32>
    %cst_8 = arith.constant dense<0.000000e+00> : vector<8x128xf32>
    %9 = tpu.matmul %7, %8, %cst_8 {dimension_numbers = #tpu.dot_dimension_numbers<[1], [0], [0], [1], [0, 0, 1, 1], [], []>} : vector<8x128xf32>, vector<128x128xf32>, vector<8x128xf32> -> vector<8x128xf32>
    %c0_9 = arith.constant 0 : index
    %c0_10 = arith.constant 0 : index
    %10 = vector.load %arg5[%c0_9, %c0_10] : memref<1x128xf32, #tpu.memory_space<vmem>>, vector<1x128xf32>
    %11 = vector.broadcast %10 : vector<1x128xf32> to vector<8x128xf32>
    %12 = arith.addf %9, %11 : vector<8x128xf32>
    %cst_11 = arith.constant 0.000000e+00 : f32
    %13 = vector.broadcast %cst_11 : f32 to vector<8x128xf32>
    %14 = arith.maximumf %12, %13 : vector<8x128xf32>
    %c0_12 = arith.constant 0 : index
    %c0_13 = arith.constant 0 : index
    %15 = vector.load %arg6[%c0_12, %c0_13] : memref<128x128xf32, #tpu.memory_space<vmem>>, vector<128x128xf32>
    %cst_14 = arith.constant dense<0.000000e+00> : vector<8x128xf32>
    %16 = tpu.matmul %14, %15, %cst_14 {dimension_numbers = #tpu.dot_dimension_numbers<[1], [0], [0], [1], [0, 0, 1, 1], [], []>} : vector<8x128xf32>, vector<128x128xf32>, vector<8x128xf32> -> vector<8x128xf32>
    %c0_15 = arith.constant 0 : index
    %c0_16 = arith.constant 0 : index
    %17 = vector.load %arg7[%c0_15, %c0_16] : memref<1x128xf32, #tpu.memory_space<vmem>>, vector<1x128xf32>
    %18 = vector.broadcast %17 : vector<1x128xf32> to vector<8x128xf32>
    %19 = arith.addf %16, %18 : vector<8x128xf32>
    %20 = tpu.iota {dimensions = array<i32: 1>} : vector<8x128xi32>
    %c10_i32 = arith.constant 10 : i32
    %21 = vector.broadcast %c10_i32 : i32 to vector<8x128xi32>
    %22 = arith.cmpi slt, %20, %21 : vector<8x128xi32>
    %cst_17 = arith.constant 0xFF800000 : f32
    %23 = vector.broadcast %cst_17 : f32 to vector<8x128xf32>
    %24 = arith.select %22, %19, %23 : vector<8x128xi1>, vector<8x128xf32>
    %cst_18 = arith.constant dense<0xFF800000> : vector<8xf32>
    %25 = vector.multi_reduction <maximumf>, %24, %cst_18 [1] : vector<8x128xf32> to vector<8xf32>
    %26 = vector.shape_cast %25 : vector<8xf32> to vector<8x1xf32>
    %27 = vector.broadcast %26 : vector<8x1xf32> to vector<8x128xf32>
    %28 = arith.subf %24, %27 : vector<8x128xf32>
    %29 = math.exp %28 : vector<8x128xf32>
    %cst_19 = arith.constant dense<0.000000e+00> : vector<8xf32>
    %30 = vector.multi_reduction <add>, %29, %cst_19 [1] : vector<8x128xf32> to vector<8xf32>
    %31 = vector.shape_cast %30 : vector<8xf32> to vector<8x1xf32>
    %32 = math.log %31 : vector<8x1xf32>
    %33 = vector.broadcast %32 : vector<8x1xf32> to vector<8x128xf32>
    %34 = arith.subf %28, %33 : vector<8x128xf32>
    %c0_20 = arith.constant 0 : index
    %c0_21 = arith.constant 0 : index
    %35 = vector.load %arg8[%c0_20, %c0_21] : memref<8x128xf32, #tpu.memory_space<vmem>>, vector<8x128xf32>
    tpu.vector_store %arg8[%c0_20, %c0_21], %34 {strides = array<i32>} : memref<8x128xf32, #tpu.memory_space<vmem>>, vector<8x128xf32>,
    return
  }
  func.func @transform_0(%arg0: i32) -> (i32, i32) {
    %c0_i32 = arith.constant 0 : i32
    %c0_i32_0 = arith.constant 0 : i32
    return %arg0, %c0_i32 : i32, i32
  }
  func.func @transform_1(%arg0: i32) -> (i32, i32) {
    %c0_i32 = arith.constant 0 : i32
    %c0_i32_0 = arith.constant 0 : i32
    %c0_i32_1 = arith.constant 0 : i32
    return %c0_i32, %c0_i32_0 : i32, i32
  }
  func.func @transform_2(%arg0: i32) -> (i32, i32) {
    %c0_i32 = arith.constant 0 : i32
    %c0_i32_0 = arith.constant 0 : i32
    %c0_i32_1 = arith.constant 0 : i32
    return %c0_i32, %c0_i32_0 : i32, i32
  }
  func.func @transform_3(%arg0: i32) -> (i32, i32) {
    %c0_i32 = arith.constant 0 : i32
    %c0_i32_0 = arith.constant 0 : i32
    %c0_i32_1 = arith.constant 0 : i32
    return %c0_i32, %c0_i32_0 : i32, i32
  }
  func.func @transform_4(%arg0: i32) -> (i32, i32) {
    %c0_i32 = arith.constant 0 : i32
    %c0_i32_0 = arith.constant 0 : i32
    %c0_i32_1 = arith.constant 0 : i32
    return %c0_i32, %c0_i32_0 : i32, i32
  }
  func.func @transform_5(%arg0: i32) -> (i32, i32) {
    %c0_i32 = arith.constant 0 : i32
    %c0_i32_0 = arith.constant 0 : i32
    %c0_i32_1 = arith.constant 0 : i32
    return %c0_i32, %c0_i32_0 : i32, i32
  }
  func.func @transform_6(%arg0: i32) -> (i32, i32) {
    %c0_i32 = arith.constant 0 : i32
    %c0_i32_0 = arith.constant 0 : i32
    %c0_i32_1 = arith.constant 0 : i32
    return %c0_i32, %c0_i32_0 : i32, i32
  }
  func.func @transform_7(%arg0: i32) -> (i32, i32) {
    %c0_i32 = arith.constant 0 : i32
    %c0_i32_0 = arith.constant 0 : i32
    return %arg0, %c0_i32 : i32, i32
  }
}

</mosaic_0001>

<bundles_post_ra>
// kernel: tpu_custom_call.1
= control target key start
LH: loop header
LB: loop body
LE: loop exit
PB: predicated region body
PF: predicated region fallthrough
CT: control target
= control target key end

     0   :  { %12 = vsyncpa [#allocation3], 0  ;;  %s909_s0 = inlined_call_operand.hbm [shape: f32[8,256], index: 0, kind: input, shape index: {}]   ;;  %s910_s1 = inlined_call_operand.hbm [shape: f32[256,128], index: 1, kind: input, shape index: {}]   ;;  %s911_s2 = inlined_call_operand.vmem [shape: f32[1,128], index: 2, kind: input, shape index: {}]   ;;  %s912_s3 = inlined_call_operand.hbm [shape: f32[128,128], index: 3, kind: input, shape index: {}]   ;;  %s913_s4 = inlined_call_operand.vmem [shape: f32[1,128], index: 4, kind: input, shape index: {}]   ;;  %s914_s5 = inlined_call_operand.hbm [shape: f32[128,128], index: 5, kind: input, shape index: {}]   ;;  %s915_s6 = inlined_call_operand.vmem [shape: f32[1,128], index: 6, kind: input, shape index: {}]   ;;  %s916_s7 = inlined_call_operand.hbm [shape: f32[8,128], index: 7, kind: output, shape index: {}]  }
   0x1   :  { %13 = vsyncpa [#allocation6], 0 }
   0x2   :  { %14 = vsyncpa [#allocation9], 0 }
   0x3   :  { %15 = vsyncpa [#allocation4], 0  ;;  %s765_s24 = smov [#allocation5]   ;;  %s647_s28 = scalar_lea.hbm %s910_s1, 4096 }
   0x4   :  { %s31_s25 = sshll.u32 %s765_s24, 4  ;;  %p648_p0 = scmp.ne.s32.totalorder %s910_s1, %s647_s28  ;;  %s32_s25 = int_to_ptr.vmem [resolvable:$true] %s31_s25 }
   0x5   :  { %p651_p1 = scmp.lt.u32.totalorder %s647_s28, %s910_s1 }
   0x7   :  { %p653_p2 = pnand %p651_p1, %p648_p0 }
   0x9   :  { %656 = shalt.err (!%p653_p2)
}
   0xa   :  { %s657_s10 = scalar_lea.vmem %s32_s25, 4096  ;;  %p662_p4 = scmp.lt.s32.totalorder %s32_s25, %s32_s25 }
   0xb   :  { %p658_p3 = scmp.ne.s32.totalorder %s32_s25, %s657_s10  ;;  %p663_p5 = scmp.lt.s32.totalorder %s657_s10, %s657_s10 }
   0xd   :  { %p664_p6 = por %p663_p5, %p662_p4 }
   0xf   :  { %p665_p7 = pnand %p664_p6, %p658_p3 }
  0x11   :  { %668 = shalt.err (!%p665_p7)
}
  0x12   :  { %s766_s11 = smov 128   ;;  %s767_s12 = smov 8  }
  0x13   :  { %37 = dma.hbm_to_vmem [thread:$0]  %s910_s1, 4096, %s32_s25, [#allocation6], %s766_s11, %s766_s11, %s767_s12  }
  0x14   :  { %s768_s15 = smov [#allocation2]   ;;  %s769_s17 = smov [#allocation7]  }
  0x15   :  { %s22_s16 = sshll.u32 %s768_s15, 4  ;;  %s45_s18 = sshll.u32 %s769_s17, 4  ;;  %s23_s16 = int_to_ptr.vmem [resolvable:$true] %s22_s16  ;;  %s46_s18 = int_to_ptr.vmem [resolvable:$true] %s45_s18 }
  0x16   :  { %s669_s21 = scalar_lea.hbm %s909_s0, 256 }
  0x17   :  { %p670_p8 = scmp.ne.s32.totalorder %s909_s0, %s669_s21  ;;  %p673_p9 = scmp.lt.u32.totalorder %s669_s21, %s909_s0 }
  0x19   :  { %p675_p10 = pnand %p673_p9, %p670_p8 }
  0x1b   :  { %678 = shalt.err (!%p675_p10)
}
  0x1c   :  { %s679_s1 = scalar_lea.vmem %s23_s16, 256  ;;  %p684_p12 = scmp.lt.s32.totalorder %s23_s16, %s23_s16 }
  0x1d   :  { %p680_p11 = scmp.ne.s32.totalorder %s23_s16, %s679_s1  ;;  %p685_p13 = scmp.lt.s32.totalorder %s679_s1, %s679_s1 }
  0x1f   :  { %p686_p0 = por %p685_p13, %p684_p12 }
  0x21   :  { %p687_p1 = pnand %p686_p0, %p680_p11 }
  0x23   :  { %690 = shalt.err (!%p687_p1)
}
  0x24   :  { %25 = dma.hbm_to_vmem [thread:$0]  %s909_s0, 256, %s23_s16, [#allocation3]  }
  0x25   :  { %s691_s30 = scalar_lea.hbm %s912_s3, 2048 }
  0x26   :  { %p692_p2 = scmp.ne.s32.totalorder %s912_s3, %s691_s30  ;;  %p695_p3 = scmp.lt.u32.totalorder %s691_s30, %s912_s3 }
  0x28   :  { %p697_p4 = pnand %p695_p3, %p692_p2 }
  0x2a   :  { %700 = shalt.err (!%p697_p4)
}
  0x2b   :  { %s701_s14 = scalar_lea.vmem %s46_s18, 2048  ;;  %p706_p6 = scmp.lt.s32.totalorder %s46_s18, %s46_s18 }
  0x2c   :  { %p702_p5 = scmp.ne.s32.totalorder %s46_s18, %s701_s14  ;;  %p707_p7 = scmp.lt.s32.totalorder %s701_s14, %s701_s14 }
  0x2e   :  { %p708_p8 = por %p707_p7, %p706_p6 }
  0x30   :  { %p709_p9 = pnand %p708_p8, %p702_p5 }
  0x32   :  { %712 = shalt.err (!%p709_p9)
}
  0x33   :  { %51 = dma.hbm_to_vmem [thread:$0]  %s912_s3, 2048, %s46_s18, [#allocation6], %s766_s11, %s766_s11, %s767_s12  }
  0x34   :  { %s770_s16 = smov [#allocation8]   ;;  %s713_s21 = scalar_lea.hbm %s914_s5, 2048 }
  0x35   :  { %s59_s17 = sshll.u32 %s770_s16, 4  ;;  %p714_p10 = scmp.ne.s32.totalorder %s914_s5, %s713_s21  ;;  %s60_s17 = int_to_ptr.vmem [resolvable:$true] %s59_s17 }
  0x36   :  { %p717_p11 = scmp.lt.u32.totalorder %s713_s21, %s914_s5 }
  0x38   :  { %p719_p12 = pnand %p717_p11, %p714_p10 }
  0x3a   :  { %722 = shalt.err (!%p719_p12)
}
  0x3b   :  { %s723_s1 = scalar_lea.vmem %s60_s17, 2048  ;;  %p728_p0 = scmp.lt.s32.totalorder %s60_s17, %s60_s17 }
  0x3c   :  { %p724_p13 = scmp.ne.s32.totalorder %s60_s17, %s723_s1  ;;  %p729_p1 = scmp.lt.s32.totalorder %s723_s1, %s723_s1 }
  0x3e   :  { %p730_p2 = por %p729_p1, %p728_p0 }
  0x40   :  { %p731_p3 = pnand %p730_p2, %p724_p13 }
  0x42   :  { %734 = shalt.err (!%p731_p3)
}
  0x43   :  { %65 = dma.hbm_to_vmem [thread:$0]  %s914_s5, 2048, %s60_s17, [#allocation9], %s766_s11, %s766_s11, %s767_s12  }
  0x44   :  { %757 = dma.done.wait [#allocation3], 256  }
  0x45   :  { %758 = vsyncadd [#allocation3], 4294967040 }
  0x46   :  { %759 = dma.done.wait [#allocation6], 6144  }
  0x47   :  { %760 = vsyncadd [#allocation6], 4294961152 }
  0x48   :  { %761 = dma.done.wait [#allocation9], 2048  }
  0x49   :  { %762 = vsyncadd [#allocation9], 4294965248  ;;  %v771_v0 = vmov 0.0|0.0   ;;  %v98_v1 = vld [vmem:[#allocation5 + $0x80] sm:$0xff]  ;;  %v99_v2 = vld [vmem:[#allocation5 + $0x88] sm:$0xff]  ;;  %vm772_vm0 = vmmov 0  }
  0x4a   :  { %585 = vmatprep.subr.bf16.mxu1 %v771_v0  ;;  %v82_v3 = vld [vmem:[#allocation5] sm:$0xff]  ;;  %v553_v4 = vpack.c.bf16 %v99_v2, %v98_v1  ;;  %v83_v5 = vld [vmem:[#allocation5 + $0x8] sm:$0xff]  ;;  %v100_v6 = vld [vmem:[#allocation5 + $0x90] sm:$0xff] }
  0x4b   :  { %v101_v7 = vld [vmem:[#allocation5 + $0x98] sm:$0xff]  ;;  %v555_v8 = vpack.c.bf16 %v83_v5, %v82_v3  ;;  %v84_v10 = vld [vmem:[#allocation5 + $0x10] sm:$0xff]  ;;  %v102_v12 = vld [vmem:[#allocation5 + $0xa0] sm:$0xff] }
  0x4c   :  { %v557_v9 = vpack.c.bf16 %v101_v7, %v100_v6  ;;  %v85_v11 = vld [vmem:[#allocation5 + $0x18] sm:$0xff]  ;;  %554 = vmatprep.subr.bf16.mxu0 %v553_v4  ;;  %v103_v13 = vld [vmem:[#allocation5 + $0xa8] sm:$0xff]  ;;  %v86_v16 = vld [vmem:[#allocation5 + $0x20] sm:$0xff] }
  0x4d   :  { %556 = vmatpush3.bf16.msra.mxu0 %v555_v8  ;;  %v559_v14 = vpack.c.bf16 %v85_v11, %v84_v10  ;;  %v561_v15 = vpack.c.bf16 %v103_v13, %v102_v12  ;;  %v87_v17 = vld [vmem:[#allocation5 + $0x28] sm:$0xff]  ;;  %v104_v18 = vld [vmem:[#allocation5 + $0xb0] sm:$0xff]  ;;  %v105_v19 = vld [vmem:[#allocation5 + $0xb8] sm:$0xff]  ;;  %v773_v12 = vmov 0.0  }
  0x4e   :  { %558 = vmatprep.subr.bf16.mxu0 %v557_v9  ;;  %v563_v20 = vpack.c.bf16 %v87_v17, %v86_v16  ;;  %v565_v21 = vpack.c.bf16 %v105_v19, %v104_v18  ;;  %v88_v22 = vld [vmem:[#allocation5 + $0x30] sm:$0xff]  ;;  %v89_v23 = vld [vmem:[#allocation5 + $0x38] sm:$0xff]  ;;  %v106_v24 = vld [vmem:[#allocation5 + $0xc0] sm:$0xff]  ;;  %515 = vmatprep.mubr.msk.f32.mxu1 %vm772_vm0, %v773_v12 }
  0x4f   :  { %v107_v25 = vld [vmem:[#allocation5 + $0xc8] sm:$0xff]  ;;  %v81_v26 = vld [vmem:[#allocation2 + $0x8] sm:$0xff]  ;;  %v192_v27 = vld [vmem:[#allocation7] sm:$0xff]  ;;  %v567_v29 = vpack.c.bf16 %v89_v23, %v88_v22 }
  0x50   :  { %185 = vmatprep.mubr.f32.mxu0 %v81_v26  ;;  %v193_v28 = vld [vmem:[#allocation7 + $0x8] sm:$0xff]  ;;  %v194_v31 = vld [vmem:[#allocation7 + $0x10] sm:$0xff]  ;;  %v195_v32 = vld [vmem:[#allocation7 + $0x18] sm:$0xff]  ;;  %v569_v33 = vpack.c.bf16 %v107_v25, %v106_v24 }
  0x51   :  { %560 = vmatpush3.bf16.msra.mxu0 %v559_v14  ;;  %v586_v30 = vpack.c.bf16 %v193_v28, %v192_v27  ;;  %v90_v34 = vld [vmem:[#allocation5 + $0x40] sm:$0xff]  ;;  %v91_v35 = vld [vmem:[#allocation5 + $0x48] sm:$0xff]  ;;  %v108_v36 = vld [vmem:[#allocation5 + $0xd0] sm:$0xff]  ;;  %v589_v38 = vpack.c.bf16 %v195_v32, %v194_v31 }
  0x52   :  { %562 = vmatprep.subr.bf16.mxu0 %v561_v15  ;;  %v109_v37 = vld [vmem:[#allocation5 + $0xd8] sm:$0xff]  ;;  %v196_v39 = vld [vmem:[#allocation7 + $0x20] sm:$0xff]  ;;  %v197_v40 = vld [vmem:[#allocation7 + $0x28] sm:$0xff]  ;;  %v571_v41 = vpack.c.bf16 %v91_v35, %v90_v34 }
  0x53   :  { %587 = vmatpush3.bf16.msra.mxu1 %v586_v30  ;;  %v573_v42 = vpack.c.bf16 %v109_v37, %v108_v36  ;;  %v92_v43 = vld [vmem:[#allocation5 + $0x50] sm:$0xff]  ;;  %v93_v44 = vld [vmem:[#allocation5 + $0x58] sm:$0xff]  ;;  %v110_v45 = vld [vmem:[#allocation5 + $0xe0] sm:$0xff]  ;;  %v592_v47 = vpack.c.bf16 %v197_v40, %v196_v39 }
  0x54   :  { %588 = vmatprep.subr.bf16.mxu1 %v771_v0  ;;  %v111_v46 = vld [vmem:[#allocation5 + $0xe8] sm:$0xff]  ;;  %v198_v48 = vld [vmem:[#allocation7 + $0x30] sm:$0xff]  ;;  %v199_v49 = vld [vmem:[#allocation7 + $0x38] sm:$0xff]  ;;  %v575_v50 = vpack.c.bf16 %v93_v44, %v92_v43 }
  0x55   :  { %564 = vmatpush3.bf16.msra.mxu0 %v563_v20  ;;  %v577_v51 = vpack.c.bf16 %v111_v46, %v110_v45  ;;  %v94_v52 = vld [vmem:[#allocation5 + $0x60] sm:$0xff]  ;;  %v95_v53 = vld [vmem:[#allocation5 + $0x68] sm:$0xff]  ;;  %v112_v54 = vld [vmem:[#allocation5 + $0xf0] sm:$0xff]  ;;  %v595_v56 = vpack.c.bf16 %v199_v49, %v198_v48 }
  0x56   :  { %566 = vmatprep.subr.bf16.mxu0 %v565_v21  ;;  %v113_v55 = vld [vmem:[#allocation5 + $0xf8] sm:$0xff]  ;;  %v200_v57 = vld [vmem:[#allocation7 + $0x40] sm:$0xff]  ;;  %v201_v58 = vld [vmem:[#allocation7 + $0x48] sm:$0xff]  ;;  %v579_v59 = vpack.c.bf16 %v95_v53, %v94_v52 }
  0x57   :  { %590 = vmatpush3.bf16.msra.mxu1 %v589_v38  ;;  %v581_v60 = vpack.c.bf16 %v113_v55, %v112_v54  ;;  %v96_v61 = vld [vmem:[#allocation5 + $0x70] sm:$0xff]  ;;  %v97_v62 = vld [vmem:[#allocation5 + $0x78] sm:$0xff]  ;;  %v598_v63 = vpack.c.bf16 %v201_v58, %v200_v57  ;;  %v204_v6 = vld [vmem:[#allocation7 + $0x60] sm:$0xff] }
  0x58   :  { %591 = vmatprep.subr.bf16.mxu1 %v771_v0  ;;  %v202_v1 = vld [vmem:[#allocation7 + $0x50] sm:$0xff]  ;;  %v203_v2 = vld [vmem:[#allocation7 + $0x58] sm:$0xff]  ;;  %v583_v3 = vpack.c.bf16 %v97_v62, %v96_v61  ;;  %v205_v7 = vld [vmem:[#allocation7 + $0x68] sm:$0xff] }
  0x59   :  { %568 = vmatpush3.bf16.msra.mxu0 %v567_v29  ;;  %v601_v4 = vpack.c.bf16 %v203_v2, %v202_v1  ;;  %v80_v5 = vld [vmem:[#allocation2] sm:$0xff]  ;;  %v604_v8 = vpack.c.bf16 %v205_v7, %v204_v6  ;;  %v207_v10 = vld [vmem:[#allocation7 + $0x78] sm:$0xff]  ;;  %v286_v13 = vld [vmem:[#allocation8] sm:$0xff] }
  0x5a   :  { %570 = vmatprep.subr.bf16.mxu0 %v569_v33  ;;  %v206_v9 = vld [vmem:[#allocation7 + $0x70] sm:$0xff]  ;;  %v287_v14 = vld [vmem:[#allocation8 + $0x8] sm:$0xff]  ;;  %v289_v17 = vld [vmem:[#allocation8 + $0x18] sm:$0xff] }
  0x5b   :  { %593 = vmatpush3.bf16.msra.mxu1 %v592_v47  ;;  %v607_v11 = vpack.c.bf16 %v207_v10, %v206_v9  ;;  %v288_v15 = vld [vmem:[#allocation8 + $0x10] sm:$0xff]  ;;  %v610_v16 = vpack.c.bf16 %v287_v14, %v286_v13  ;;  %v290_v19 = vld [vmem:[#allocation8 + $0x20] sm:$0xff]  ;;  %v291_v20 = vld [vmem:[#allocation8 + $0x28] sm:$0xff]  ;;  %v379_v47 = vlaneseq }
  0x5c   :  { %594 = vmatprep.subr.bf16.mxu1 %v771_v0  ;;  %v613_v18 = vpack.c.bf16 %v289_v17, %v288_v15  ;;  %v616_v21 = vpack.c.bf16 %v291_v20, %v290_v19  ;;  %v292_v22 = vld [vmem:[#allocation8 + $0x30] sm:$0xff]  ;;  %v293_v23 = vld [vmem:[#allocation8 + $0x38] sm:$0xff]  ;;  %v294_v25 = vld [vmem:[#allocation8 + $0x40] sm:$0xff] }
  0x5d   :  { %572 = vmatpush3.bf16.msra.mxu0 %v571_v41  ;;  %v619_v24 = vpack.c.bf16 %v293_v23, %v292_v22  ;;  %v295_v26 = vld [vmem:[#allocation8 + $0x48] sm:$0xff]  ;;  %v296_v28 = vld [vmem:[#allocation8 + $0x50] sm:$0xff]  ;;  %v297_v29 = vld [vmem:[#allocation8 + $0x58] sm:$0xff]  ;;  %v380_v48 = vand.u32 127, %v379_v47 }
  0x5e   :  { %574 = vmatprep.subr.bf16.mxu0 %v573_v42  ;;  %v622_v27 = vpack.c.bf16 %v295_v26, %v294_v25  ;;  %v625_v30 = vpack.c.bf16 %v297_v29, %v296_v28  ;;  %v298_v31 = vld [vmem:[#allocation8 + $0x60] sm:$0xff]  ;;  %v299_v32 = vld [vmem:[#allocation8 + $0x68] sm:$0xff]  ;;  %v411_v35 = vld [vmem:[%s911_s2] ss:$0 sm:$0xff] }
  0x5f   :  { %596 = vmatpush3.bf16.msra.mxu1 %v595_v56  ;;  %v628_v33 = vpack.c.bf16 %v299_v32, %v298_v31  ;;  %v300_v40 = vld [vmem:[#allocation8 + $0x70] sm:$0xff]  ;;  %v301_v41 = vld [vmem:[#allocation8 + $0x78] sm:$0xff]  ;;  %vm381_vm1 = vcmp.lt.s32.totalorder %v380_v48, 10 }
  0x60   :  { %597 = vmatprep.subr.bf16.mxu1 %v771_v0  ;;  %v631_v42 = vpack.c.bf16 %v301_v41, %v300_v40  ;;  %v412_v43 = vld [vmem:[%s913_s4] ss:$0 sm:$0xff]  ;;  %s774_s4 = smov [#allocation10]  }
  0x61   :  { %576 = vmatpush3.bf16.msra.mxu0 %v575_v50  ;;  %v413_v49 = vld [vmem:[%s915_s6] ss:$0 sm:$0xff]  ;;  %s400_s28 = sshll.u32 %s774_s4, 4  ;;  %s401_s28 = int_to_ptr.vmem [resolvable:$true] %s400_s28 }
  0x62   :  { %578 = vmatprep.subr.bf16.mxu0 %v577_v51  ;;  %s735_s6 = scalar_lea.vmem %s401_s28, 128  ;;  %p740_p5 = scmp.lt.s32.totalorder %s401_s28, %s401_s28 }
  0x63   :  { %599 = vmatpush3.bf16.msra.mxu1 %v598_v63  ;;  %p736_p4 = scmp.ne.s32.totalorder %s401_s28, %s735_s6  ;;  %p741_p6 = scmp.lt.s32.totalorder %s735_s6, %s735_s6 }
  0x64   :  { %600 = vmatprep.subr.bf16.mxu1 %v771_v0 }
  0x65   :  { %580 = vmatpush3.bf16.msra.mxu0 %v579_v59  ;;  %p742_p7 = por %p741_p6, %p740_p5 }
  0x66   :  { %582 = vmatprep.subr.bf16.mxu0 %v581_v60 }
  0x67   :  { %602 = vmatpush3.bf16.msra.mxu1 %v601_v4  ;;  %p743_p8 = pnand %p742_p7, %p736_p4 }
  0x68   :  { %603 = vmatprep.subr.bf16.mxu1 %v771_v0 }
  0x69   :  { %584 = vmatpush3.bf16.msra.mxu0 %v583_v3 }
  0x6a   :  { %609 = vmatprep.subr.bf16.mxu0 %v771_v0 }
  0x6b   :  { %605 = vmatpush3.bf16.msra.mxu1 %v604_v8 }
  0x6c   :  { %186 = vmatmul.mubr.f32.vlgmr.msra.gmra.mrb[0].mxu0 %v80_v5  ;;  %606 = vmatprep.subr.bf16.mxu1 %v771_v0 }
  0x6d   :  { %550 = vmatprep.mubr.msk.f32.mxu0 %vm772_vm0, %v773_v12  ;;  %611 = vmatpush3.bf16.msra.mxu0 %v610_v16 }
  0x6e   :  { %612 = vmatprep.subr.bf16.mxu0 %v771_v0 }
  0x6f   :  { %608 = vmatpush3.bf16.msra.mxu1 %v607_v11 }
  0x71   :  { %614 = vmatpush3.bf16.msra.mxu0 %v613_v18 }
  0x72   :  { %615 = vmatprep.subr.bf16.mxu0 %v771_v0 }
  0x75   :  { %617 = vmatpush3.bf16.msra.mxu0 %v616_v21 }
  0x76   :  { %618 = vmatprep.subr.bf16.mxu0 %v771_v0 }
  0x79   :  { %620 = vmatpush3.bf16.msra.mxu0 %v619_v24 }
  0x7a   :  { %621 = vmatprep.subr.bf16.mxu0 %v771_v0 }
  0x7d   :  { %623 = vmatpush3.bf16.msra.mxu0 %v622_v27 }
  0x7e   :  { %624 = vmatprep.subr.bf16.mxu0 %v771_v0 }
  0x81   :  { %626 = vmatpush3.bf16.msra.mxu0 %v625_v30 }
  0x82   :  { %627 = vmatprep.subr.bf16.mxu0 %v771_v0 }
  0x85   :  { %629 = vmatpush3.bf16.msra.mxu0 %v628_v33 }
  0x86   :  { %630 = vmatprep.subr.bf16.mxu0 %v771_v0 }
  0x89   :  { %632 = vmatpush3.bf16.msra.mxu0 %v631_v42 }
 0x13f   :  { %v446_v34 = vpop.f32.mrb[0].mxu0 }
 0x140   :  { %v447_v36 = vpop.f32.mrb[1].mxu0 }
 0x141   :  { %v448_v37 = vadd.f32 %v447_v36, %v446_v34 }
 0x143   :  { %v188_v38 = vadd.f32 %v448_v37, %v411_v35 }
 0x145   :  { %v191_v39 = vmax.f32 %v188_v38, 0.0 }
 0x147   :  { %516 = vmatmul.mubr.f32.vlgmr.msra.gmra.mrb[0].mxu1 %v191_v39 }
 0x21a   :  { %v281_v44 = vpop.f32.mrb[0].mxu1 }
 0x21b   :  { %v282_v0 = vadd.f32 %v412_v43, %v281_v44  ;;  %v517_v45 = vpop.f32.mrb[1].mxu1 }
 0x21d   :  { %v285_v46 = vmax.f32 %v282_v0, 0.0 }
 0x21f   :  { %551 = vmatmul.mubr.f32.vlgmr.msra.gmra.mrb[2].mxu0 %v285_v46 }
 0x2f2   :  { %v375_v50 = vpop.f32.mrb[2].mxu0 }
 0x2f3   :  { %v376_v51 = vadd.f32 %v413_v49, %v375_v50  ;;  %v552_v52 = vpop.f32.mrb[3].mxu0 }
 0x2f5   :  { %v382_v53 = vsel %vm381_vm1, %v376_v51, -inf }
 0x2f6   :  { %383 = vmax.xlane.f32.xlu0 %v382_v53 }
 0x383   :  { %v384_v54 = vpop.xlane.xlu0 %383 }
 0x384   :  { %v385_v55 = vsub.f32 %v382_v53, %v384_v54 }
 0x386   :  { %v386_v56 = vmul.f32 1.442695, %v385_v55 }
 0x388   :  { %643 = vpow2.f32 %v386_v56 }
 0x392   :  { %v644_v57 = vpop.eup %643 }
 0x393   :  { %388 = vadd.xlane.f32.xlu0 %v644_v57 }
 0x420   :  { %v389_v58 = vpop.xlane.xlu0 %388 }
 0x421   :  { %645 = vlog2.f32 %v389_v58 }
 0x42b   :  { %v646_v59 = vpop.eup %645 }
 0x42c   :  { %v391_v60 = vmul.f32 0.6931472, %v646_v59 }
 0x42e   :  { %v392_v61 = vsub.f32 %v385_v55, %v391_v60 }
 0x430   :  { %393 = vst [vmem:[#allocation10] sm:$0xff] %v392_v61 }
 0x431   :  { %746 = shalt.err (!%p743_p8)
}
 0x432   :  { %s747_s8 = scalar_lea.hbm %s916_s7, 128 }
 0x433   :  { %p748_p9 = scmp.ne.s32.totalorder %s916_s7, %s747_s8  ;;  %p751_p10 = scmp.lt.u32.totalorder %s747_s8, %s916_s7 }
 0x435   :  { %p753_p11 = pnand %p751_p10, %p748_p9 }
 0x437   :  { %756 = shalt.err (!%p753_p11)
}
 0x438   :  { %403 = dma.vmem_to_hbm [thread:$0]  %s401_s28, 128, %s916_s7, [#allocation4]  }
 0x439   :  { %763 = dma.done.wait [#allocation4], 128  }
 0x43a   :  { %764 = vsyncadd [#allocation4], 4294967168 }
 0x43b   :  { %407 = vsyncpa [#allocation3], 1 }
 0x43c   :  { %408 = vsyncpa [#allocation6], 1 }
 0x43d   :  { %409 = vsyncpa [#allocation9], 1 }
 0x43e   :  { %410 = vsyncpa [#allocation4], 1 }

</bundles_post_ra>
